<compile_context>
chip_gen: v5e
topology: v5e:2x2
jax: 0.10.0
libtpu: 0.0.40
codegen_flags: <defaults>
</compile_context>

<pallas_src>
import numpy as np

import jax
import jax.numpy as jnp
from jax.experimental import pallas as pl
from jax.experimental.pallas import tpu as pltpu


OUTPUT_SIZE = 16                # 4x4 board
DENSE_LAYERS = (128, 64, 16)
_S = 4                          # board side
_C1 = _S - 1                    # conv1 output side (3)
_C2 = _C1 - 1                   # conv2 output side (2)

# Static im2col index map for conv1's board channel:
#   p1[q, ki*2+kj] = input[(oi+ki)*4 + (oj+kj)],  q = oi*3 + oj.
_P1_IDX = np.array(
    [[(oi + ki) * _S + (oj + kj) for ki in range(2) for kj in range(2)]
     for oi in range(_C1) for oj in range(_C1)],
    dtype=np.int32)                                            # (9, 4)

# conv2 row gather: output row r=(oi,oj) pulls conv1 spatial row (oi+ki)*3+(oj+kj)
# for each 2x2 tap k=(ki,kj).
_CONV2_ROWS = [[(oi + ki) * _C1 + (oj + kj)
                for ki in range(2) for kj in range(2)]
               for oi in range(_C2) for oj in range(_C2)]      # 4 x 4

# ----- packed parameter buffer layout (rows of a (280, 128) f32 buffer) ----- #
_W1EFF_OFF = 0          # rows 0..44 : effective conv1 weight, 5 groups x 9 rows,
                        #              group g holds m = 4g..4g+3 in 32-lane blocks
_B1_ROW = 48            # lanes 0:32
_B2_ROW = 49            # lanes 0:32
_B3_ROW = 50            # lanes 0:64
_B4_ROW = 51            # lanes 0:16
_W2_OFF = 56            # rows 56..87  : conv2 weight (32, 128), 4 taps along N
_W3_OFF = 88            # rows 88..215 : dense-1 weight (128, 64) in lanes 0:64
_W4_OFF = 216           # rows 216..279: dense-2 weight (64, 16) in lanes 0:16
_N_PARAM_ROWS = 280


# ----------------------------- Pallas kernel ------------------------------ #
def _fused_forward_kernel(inp_ref, p_ref, o_ref):
    f32 = jnp.float32

    # ---- Conv2d(2->32, 2x2) + ReLU via scalar-broadcast FMAs ---------------
    # h1[q, co] = b1[co] + sum_m inp[m] * W1eff[m, q, co]
    acc = inp_ref[0] * p_ref[0:9, 0:32]
    for m in range(1, 17):
        g, j = divmod(m, 4)
        acc = acc + inp_ref[m] * p_ref[g * 9:(g + 1) * 9, j * 32:(j + 1) * 32]
    h1 = jnp.maximum(acc + p_ref[_B1_ROW:_B1_ROW + 1, 0:32], 0.0)   # (9, 32)

    # ---- Conv2d(32->32, 2x2): one lane-dense channel-mix matmul ------------
    w2_all = p_ref[_W2_OFF:_W2_OFF + 32, :]                          # (32, 128)
    g_all = jnp.dot(h1, w2_all, preferred_element_type=f32)         # (9, 128)

    # ---- assemble conv2 output rows + ReLU, build the (1,128) flatten ------
    b2 = p_ref[_B2_ROW:_B2_ROW + 1, 0:32]                            # (1, 32)
    rows = []
    for r in range(4):                                               # 2x2 outputs
        row = b2
        for k in range(4):                                           # 2x2 taps
            q = _CONV2_ROWS[r][k]
            row = row + g_all[q:q + 1, k * 32:(k + 1) * 32]
        rows.append(jnp.maximum(row, 0.0))
    flat = jnp.concatenate(rows, axis=1)                             # (1, 128)

    # ---- Linear(128->64) + ReLU: single K=128 MXU dot -----------------------
    w3 = p_ref[_W3_OFF:_W3_OFF + 128, 0:64]                          # (128, 64)
    b3 = p_ref[_B3_ROW:_B3_ROW + 1, 0:64]                            # (1, 64)
    h3 = jnp.maximum(jnp.dot(flat, w3, preferred_element_type=f32) + b3, 0.0)

    # ---- Linear(64->16) + ReLU, then tanh (matches the PyTorch forward) ----
    w4 = p_ref[_W4_OFF:_W4_OFF + 64, 0:16]                           # (64, 16)
    b4 = p_ref[_B4_ROW:_B4_ROW + 1, 0:16]                            # (1, 16)
    h4 = jnp.maximum(jnp.dot(h3, w4, preferred_element_type=f32) + b4, 0.0)
    o_ref[...] = jnp.tanh(h4).astype(o_ref.dtype)


# --------------------------- parameter handling ---------------------------- #
def init_params(key, dense_layers=DENSE_LAYERS):
    """PyTorch-default-style uniform init, raw (torch-layout) parameters."""
    def u(k, shape, fan_in):
        bound = 1.0 / (fan_in ** 0.5)
        return jax.random.uniform(k, shape, jnp.float32, -bound, bound)

    keys = jax.random.split(key, 4 + 2 * (len(dense_layers) - 1))
    params = {
        "w1": u(keys[0], (32, 2, 2, 2), 2 * 2 * 2),     # Conv2d(2, 32, (2,2))
        "b1": u(keys[1], (32,), 2 * 2 * 2),
        "w2": u(keys[2], (32, 32, 2, 2), 32 * 2 * 2),   # Conv2d(32, 32, (2,2))
        "b2": u(keys[3], (32,), 32 * 2 * 2),
        "dense_w": [],
        "dense_b": [],
    }
    ki = 4
    for i in range(len(dense_layers) - 1):
        fin, fout = dense_layers[i], dense_layers[i + 1]
        params["dense_w"].append(u(keys[ki], (fout, fin), fin))   # torch Linear (out, in)
        params["dense_b"].append(u(keys[ki + 1], (fout,), fin))
        ki += 2
    return params


def prep_kernel_params(raw):
    """One-time hoist: pack ALL weights/biases into one lane-dense (280,128) buffer."""
    f32 = jnp.float32

    # Effective conv1 weight: h1[q,co] = b1[co] + sum_m inp[m] * W1eff[m,q,co].
    w1 = raw["w1"].astype(f32)                       # (32, 2, 2, 2) = (co, ci, ki, kj)
    w1_board = w1[:, 0].reshape(32, 4)               # (co, k)
    w1_player = w1[:, 1].reshape(32, 4)              # (co, k)
    onehot = (jnp.arange(16)[:, None, None] ==
              jnp.asarray(_P1_IDX)[None]).astype(f32)                  # (16, 9, 4)
    w1eff_board = jnp.einsum("mqk,ck->mqc", onehot, w1_board)          # (16, 9, 32)
    w1eff_player = jnp.broadcast_to(w1_player.sum(1)[None, None, :], (1, 9, 32))
    w1eff = jnp.concatenate([w1eff_board, w1eff_player], axis=0)       # (17, 9, 32)
    w1eff = jnp.pad(w1eff, ((0, 3), (0, 0), (0, 0)))                   # (20, 9, 32)
    # Pack 4 m-slabs side by side along lanes -> (5, 9, 128) -> (45, 128).
    w1eff4 = w1eff.reshape(5, 4, 9, 32).transpose(0, 2, 1, 3).reshape(45, 128)

    # Conv2 weight: taps side by side along N -> (ci, (ki,kj,co)) = (32, 128).
    w2_all = jnp.transpose(raw["w2"].astype(f32), (1, 2, 3, 0)).reshape(32, 128)

    # Dense-1 weight: kernel consumes the flatten in (spatial r, channel) order
    # instead of torch's (channel, spatial r) order -> permute the K dimension.
    w3 = raw["dense_w"][0].astype(f32)               # (64, 128) torch layout
    n_d1 = w3.shape[0]
    w3k = w3.T.reshape(32, 4, n_d1).transpose(1, 0, 2).reshape(128, n_d1)  # (128, 64)
    w4k = raw["dense_w"][1].astype(f32).T            # (64, 16)

    buf = jnp.zeros((_N_PARAM_ROWS, 128), f32)
    buf = buf.at[_W1EFF_OFF:_W1EFF_OFF + 45, :].set(w1eff4)
    buf = buf.at[_B1_ROW, 0:32].set(raw["b1"].astype(f32))
    buf = buf.at[_B2_ROW, 0:32].set(raw["b2"].astype(f32))
    buf = buf.at[_B3_ROW, 0:64].set(raw["dense_b"][0].astype(f32))
    buf = buf.at[_B4_ROW, 0:16].set(raw["dense_b"][1].astype(f32))
    buf = buf.at[_W2_OFF:_W2_OFF + 32, :].set(w2_all)
    buf = buf.at[_W3_OFF:_W3_OFF + 128, 0:64].set(w3k)
    buf = buf.at[_W4_OFF:_W4_OFF + 64, 0:16].set(w4k)
    return buf


# ------------------------------- forward ----------------------------------- #
@jax.jit
def network_forward(inp, packed_params):
    """Full Network.forward for one board as a single fused Pallas call."""
    inp = inp.astype(jnp.float32)                    # 17 scalars -> SMEM
    return pl.pallas_call(
        _fused_forward_kernel,
        out_shape=jax.ShapeDtypeStruct((1, DENSE_LAYERS[-1]), jnp.float32),
        in_specs=[pl.BlockSpec(memory_space=pltpu.MemorySpace.SMEM),
                  pl.BlockSpec(memory_space=pltpu.MemorySpace.VMEM)],
        out_specs=pl.BlockSpec(memory_space=pltpu.MemorySpace.VMEM),
        cost_estimate=pl.CostEstimate(flops=100_000, transcendentals=16,
                                      bytes_accessed=150_000),
    )(inp, packed_params)


# ------------------------- pure-JAX reference ------------------------------ #
def reference_forward(inp, raw, output_size=OUTPUT_SIZE):
    """Independent reference mirroring the PyTorch module (lax.conv + dense)."""
    s = int(output_size ** 0.5)
    inp = inp.astype(jnp.float32)
    board = inp[:output_size].reshape(s, s)
    player = jnp.full((s, s), inp[-1], jnp.float32)
    x = jnp.stack([board, player])[None]                         # (1, 2, 4, 4)
    dn = ("NCHW", "OIHW", "NCHW")
    y = jax.lax.conv_general_dilated(x, raw["w1"], (1, 1), "VALID",
                                     dimension_numbers=dn)
    y = jnp.maximum(y + raw["b1"][None, :, None, None], 0.0)
    y = jax.lax.conv_general_dilated(y, raw["w2"], (1, 1), "VALID",
                                     dimension_numbers=dn)
    y = jnp.maximum(y + raw["b2"][None, :, None, None], 0.0)
    h = jnp.maximum(y.reshape(1, -1), 0.0)                       # Flatten (+ ReLU no-op)
    for w, b in zip(raw["dense_w"], raw["dense_b"]):
        h = jnp.maximum(h @ w.T + b[None, :], 0.0)               # relu after every layer
    return jnp.tanh(h)                                           # tanh on the last relu


# --------------------------------- main ------------------------------------ #
if __name__ == "__main__":
    raw_params = init_params(jax.random.PRNGKey(0), DENSE_LAYERS)
    packed = prep_kernel_params(raw_params)

    # Input vector: 16 board cells + trailing "player" scalar (length 17).
    inp = jax.random.uniform(jax.random.PRNGKey(1), (OUTPUT_SIZE + 1,),
                             jnp.float32, -1.0, 1.0)

    out = jax.block_until_ready(network_forward(inp, packed))
    ref = jax.block_until_ready(reference_forward(inp, raw_params))

    assert out.shape == (1, DENSE_LAYERS[-1]), out.shape
    assert jnp.allclose(out, ref, atol=1e-5, rtol=1e-5), (out, ref)
    print("KERNEL_OK")
</pallas_src>

<mosaic_0001>
module attributes {stable_mosaic.version = 11 : i64} {
  func.func @_fused_forward_kernel(%arg0: memref<17xf32, #tpu.memory_space<smem>>, %arg1: memref<280x128xf32, #tpu.memory_space<vmem>>, %arg2: memref<1x16xf32, #tpu.memory_space<vmem>>) attributes {dimension_semantics = [], scalar_prefetch = 0 : i64, scratch_operands = 0 : i64, tpu.core_type = #tpu.core_type<tc>} {
    %c0 = arith.constant 0 : index
    %0 = memref.load %arg0[%c0] : memref<17xf32, #tpu.memory_space<smem>>
    %c0_0 = arith.constant 0 : index
    %c0_1 = arith.constant 0 : index
    %1 = vector.load %arg1[%c0_0, %c0_1] : memref<280x128xf32, #tpu.memory_space<vmem>>, vector<9x32xf32>
    %2 = vector.broadcast %0 : f32 to vector<9x32xf32>
    %3 = arith.mulf %2, %1 : vector<9x32xf32>
    %c1 = arith.constant 1 : index
    %4 = memref.load %arg0[%c1] : memref<17xf32, #tpu.memory_space<smem>>
    %c0_2 = arith.constant 0 : index
    %c32 = arith.constant 32 : index
    %5 = vector.load %arg1[%c0_2, %c32] : memref<280x128xf32, #tpu.memory_space<vmem>>, vector<9x32xf32>
    %6 = vector.broadcast %4 : f32 to vector<9x32xf32>
    %7 = arith.mulf %6, %5 : vector<9x32xf32>
    %8 = arith.addf %3, %7 : vector<9x32xf32>
    %c2 = arith.constant 2 : index
    %9 = memref.load %arg0[%c2] : memref<17xf32, #tpu.memory_space<smem>>
    %c0_3 = arith.constant 0 : index
    %c64 = arith.constant 64 : index
    %10 = vector.load %arg1[%c0_3, %c64] : memref<280x128xf32, #tpu.memory_space<vmem>>, vector<9x32xf32>
    %11 = vector.broadcast %9 : f32 to vector<9x32xf32>
    %12 = arith.mulf %11, %10 : vector<9x32xf32>
    %13 = arith.addf %8, %12 : vector<9x32xf32>
    %c3 = arith.constant 3 : index
    %14 = memref.load %arg0[%c3] : memref<17xf32, #tpu.memory_space<smem>>
    %c0_4 = arith.constant 0 : index
    %c96 = arith.constant 96 : index
    %15 = vector.load %arg1[%c0_4, %c96] : memref<280x128xf32, #tpu.memory_space<vmem>>, vector<9x32xf32>
    %16 = vector.broadcast %14 : f32 to vector<9x32xf32>
    %17 = arith.mulf %16, %15 : vector<9x32xf32>
    %18 = arith.addf %13, %17 : vector<9x32xf32>
    %c4 = arith.constant 4 : index
    %19 = memref.load %arg0[%c4] : memref<17xf32, #tpu.memory_space<smem>>
    %c9 = arith.constant 9 : index
    %c0_5 = arith.constant 0 : index
    %20 = vector.load %arg1[%c9, %c0_5] : memref<280x128xf32, #tpu.memory_space<vmem>>, vector<9x32xf32>
    %21 = vector.broadcast %19 : f32 to vector<9x32xf32>
    %22 = arith.mulf %21, %20 : vector<9x32xf32>
    %23 = arith.addf %18, %22 : vector<9x32xf32>
    %c5 = arith.constant 5 : index
    %24 = memref.load %arg0[%c5] : memref<17xf32, #tpu.memory_space<smem>>
    %c9_6 = arith.constant 9 : index
    %c32_7 = arith.constant 32 : index
    %25 = vector.load %arg1[%c9_6, %c32_7] : memref<280x128xf32, #tpu.memory_space<vmem>>, vector<9x32xf32>
    %26 = vector.broadcast %24 : f32 to vector<9x32xf32>
    %27 = arith.mulf %26, %25 : vector<9x32xf32>
    %28 = arith.addf %23, %27 : vector<9x32xf32>
    %c6 = arith.constant 6 : index
    %29 = memref.load %arg0[%c6] : memref<17xf32, #tpu.memory_space<smem>>
    %c9_8 = arith.constant 9 : index
    %c64_9 = arith.constant 64 : index
    %30 = vector.load %arg1[%c9_8, %c64_9] : memref<280x128xf32, #tpu.memory_space<vmem>>, vector<9x32xf32>
    %31 = vector.broadcast %29 : f32 to vector<9x32xf32>
    %32 = arith.mulf %31, %30 : vector<9x32xf32>
    %33 = arith.addf %28, %32 : vector<9x32xf32>
    %c7 = arith.constant 7 : index
    %34 = memref.load %arg0[%c7] : memref<17xf32, #tpu.memory_space<smem>>
    %c9_10 = arith.constant 9 : index
    %c96_11 = arith.constant 96 : index
    %35 = vector.load %arg1[%c9_10, %c96_11] : memref<280x128xf32, #tpu.memory_space<vmem>>, vector<9x32xf32>
    %36 = vector.broadcast %34 : f32 to vector<9x32xf32>
    %37 = arith.mulf %36, %35 : vector<9x32xf32>
    %38 = arith.addf %33, %37 : vector<9x32xf32>
    %c8 = arith.constant 8 : index
    %39 = memref.load %arg0[%c8] : memref<17xf32, #tpu.memory_space<smem>>
    %c18 = arith.constant 18 : index
    %c0_12 = arith.constant 0 : index
    %40 = vector.load %arg1[%c18, %c0_12] : memref<280x128xf32, #tpu.memory_space<vmem>>, vector<9x32xf32>
    %41 = vector.broadcast %39 : f32 to vector<9x32xf32>
    %42 = arith.mulf %41, %40 : vector<9x32xf32>
    %43 = arith.addf %38, %42 : vector<9x32xf32>
    %c9_13 = arith.constant 9 : index
    %44 = memref.load %arg0[%c9_13] : memref<17xf32, #tpu.memory_space<smem>>
    %c18_14 = arith.constant 18 : index
    %c32_15 = arith.constant 32 : index
    %45 = vector.load %arg1[%c18_14, %c32_15] : memref<280x128xf32, #tpu.memory_space<vmem>>, vector<9x32xf32>
    %46 = vector.broadcast %44 : f32 to vector<9x32xf32>
    %47 = arith.mulf %46, %45 : vector<9x32xf32>
    %48 = arith.addf %43, %47 : vector<9x32xf32>
    %c10 = arith.constant 10 : index
    %49 = memref.load %arg0[%c10] : memref<17xf32, #tpu.memory_space<smem>>
    %c18_16 = arith.constant 18 : index
    %c64_17 = arith.constant 64 : index
    %50 = vector.load %arg1[%c18_16, %c64_17] : memref<280x128xf32, #tpu.memory_space<vmem>>, vector<9x32xf32>
    %51 = vector.broadcast %49 : f32 to vector<9x32xf32>
    %52 = arith.mulf %51, %50 : vector<9x32xf32>
    %53 = arith.addf %48, %52 : vector<9x32xf32>
    %c11 = arith.constant 11 : index
    %54 = memref.load %arg0[%c11] : memref<17xf32, #tpu.memory_space<smem>>
    %c18_18 = arith.constant 18 : index
    %c96_19 = arith.constant 96 : index
    %55 = vector.load %arg1[%c18_18, %c96_19] : memref<280x128xf32, #tpu.memory_space<vmem>>, vector<9x32xf32>
    %56 = vector.broadcast %54 : f32 to vector<9x32xf32>
    %57 = arith.mulf %56, %55 : vector<9x32xf32>
    %58 = arith.addf %53, %57 : vector<9x32xf32>
    %c12 = arith.constant 12 : index
    %59 = memref.load %arg0[%c12] : memref<17xf32, #tpu.memory_space<smem>>
    %c27 = arith.constant 27 : index
    %c0_20 = arith.constant 0 : index
    %60 = vector.load %arg1[%c27, %c0_20] : memref<280x128xf32, #tpu.memory_space<vmem>>, vector<9x32xf32>
    %61 = vector.broadcast %59 : f32 to vector<9x32xf32>
    %62 = arith.mulf %61, %60 : vector<9x32xf32>
    %63 = arith.addf %58, %62 : vector<9x32xf32>
    %c13 = arith.constant 13 : index
    %64 = memref.load %arg0[%c13] : memref<17xf32, #tpu.memory_space<smem>>
    %c27_21 = arith.constant 27 : index
    %c32_22 = arith.constant 32 : index
    %65 = vector.load %arg1[%c27_21, %c32_22] : memref<280x128xf32, #tpu.memory_space<vmem>>, vector<9x32xf32>
    %66 = vector.broadcast %64 : f32 to vector<9x32xf32>
    %67 = arith.mulf %66, %65 : vector<9x32xf32>
    %68 = arith.addf %63, %67 : vector<9x32xf32>
    %c14 = arith.constant 14 : index
    %69 = memref.load %arg0[%c14] : memref<17xf32, #tpu.memory_space<smem>>
    %c27_23 = arith.constant 27 : index
    %c64_24 = arith.constant 64 : index
    %70 = vector.load %arg1[%c27_23, %c64_24] : memref<280x128xf32, #tpu.memory_space<vmem>>, vector<9x32xf32>
    %71 = vector.broadcast %69 : f32 to vector<9x32xf32>
    %72 = arith.mulf %71, %70 : vector<9x32xf32>
    %73 = arith.addf %68, %72 : vector<9x32xf32>
    %c15 = arith.constant 15 : index
    %74 = memref.load %arg0[%c15] : memref<17xf32, #tpu.memory_space<smem>>
    %c27_25 = arith.constant 27 : index
    %c96_26 = arith.constant 96 : index
    %75 = vector.load %arg1[%c27_25, %c96_26] : memref<280x128xf32, #tpu.memory_space<vmem>>, vector<9x32xf32>
    %76 = vector.broadcast %74 : f32 to vector<9x32xf32>
    %77 = arith.mulf %76, %75 : vector<9x32xf32>
    %78 = arith.addf %73, %77 : vector<9x32xf32>
    %c16 = arith.constant 16 : index
    %79 = memref.load %arg0[%c16] : memref<17xf32, #tpu.memory_space<smem>>
    %c36 = arith.constant 36 : index
    %c0_27 = arith.constant 0 : index
    %80 = vector.load %arg1[%c36, %c0_27] : memref<280x128xf32, #tpu.memory_space<vmem>>, vector<9x32xf32>
    %81 = vector.broadcast %79 : f32 to vector<9x32xf32>
    %82 = arith.mulf %81, %80 : vector<9x32xf32>
    %83 = arith.addf %78, %82 : vector<9x32xf32>
    %c48 = arith.constant 48 : index
    %c0_28 = arith.constant 0 : index
    %84 = vector.load %arg1[%c48, %c0_28] : memref<280x128xf32, #tpu.memory_space<vmem>>, vector<1x32xf32>
    %85 = vector.broadcast %84 : vector<1x32xf32> to vector<9x32xf32>
    %86 = arith.addf %83, %85 : vector<9x32xf32>
    %cst = arith.constant 0.000000e+00 : f32
    %87 = vector.broadcast %cst : f32 to vector<9x32xf32>
    %88 = arith.maximumf %86, %87 : vector<9x32xf32>
    %c56 = arith.constant 56 : index
    %c0_29 = arith.constant 0 : index
    %89 = vector.load %arg1[%c56, %c0_29] : memref<280x128xf32, #tpu.memory_space<vmem>>, vector<32x128xf32>
    %cst_30 = arith.constant dense<0.000000e+00> : vector<9x128xf32>
    %90 = tpu.matmul %88, %89, %cst_30 {dimension_numbers = #tpu.dot_dimension_numbers<[1], [0], [0], [1], [0, 0, 1, 1], [], []>} : vector<9x32xf32>, vector<32x128xf32>, vector<9x128xf32> -> vector<9x128xf32>
    %c49 = arith.constant 49 : index
    %c0_31 = arith.constant 0 : index
    %91 = vector.load %arg1[%c49, %c0_31] : memref<280x128xf32, #tpu.memory_space<vmem>>, vector<1x32xf32>
    %92 = vector.extract_strided_slice %90 {offsets = [0, 0], sizes = [1, 32], strides = [1, 1]} : vector<9x128xf32> to vector<1x32xf32>
    %93 = arith.addf %91, %92 : vector<1x32xf32>
    %94 = vector.extract_strided_slice %90 {offsets = [1, 32], sizes = [1, 32], strides = [1, 1]} : vector<9x128xf32> to vector<1x32xf32>
    %95 = arith.addf %93, %94 : vector<1x32xf32>
    %96 = vector.extract_strided_slice %90 {offsets = [3, 64], sizes = [1, 32], strides = [1, 1]} : vector<9x128xf32> to vector<1x32xf32>
    %97 = arith.addf %95, %96 : vector<1x32xf32>
    %98 = vector.extract_strided_slice %90 {offsets = [4, 96], sizes = [1, 32], strides = [1, 1]} : vector<9x128xf32> to vector<1x32xf32>
    %99 = arith.addf %97, %98 : vector<1x32xf32>
    %cst_32 = arith.constant 0.000000e+00 : f32
    %100 = vector.broadcast %cst_32 : f32 to vector<1x32xf32>
    %101 = arith.maximumf %99, %100 : vector<1x32xf32>
    %102 = vector.extract_strided_slice %90 {offsets = [1, 0], sizes = [1, 32], strides = [1, 1]} : vector<9x128xf32> to vector<1x32xf32>
    %103 = arith.addf %91, %102 : vector<1x32xf32>
    %104 = vector.extract_strided_slice %90 {offsets = [2, 32], sizes = [1, 32], strides = [1, 1]} : vector<9x128xf32> to vector<1x32xf32>
    %105 = arith.addf %103, %104 : vector<1x32xf32>
    %106 = vector.extract_strided_slice %90 {offsets = [4, 64], sizes = [1, 32], strides = [1, 1]} : vector<9x128xf32> to vector<1x32xf32>
    %107 = arith.addf %105, %106 : vector<1x32xf32>
    %108 = vector.extract_strided_slice %90 {offsets = [5, 96], sizes = [1, 32], strides = [1, 1]} : vector<9x128xf32> to vector<1x32xf32>
    %109 = arith.addf %107, %108 : vector<1x32xf32>
    %cst_33 = arith.constant 0.000000e+00 : f32
    %110 = vector.broadcast %cst_33 : f32 to vector<1x32xf32>
    %111 = arith.maximumf %109, %110 : vector<1x32xf32>
    %112 = vector.extract_strided_slice %90 {offsets = [3, 0], sizes = [1, 32], strides = [1, 1]} : vector<9x128xf32> to vector<1x32xf32>
    %113 = arith.addf %91, %112 : vector<1x32xf32>
    %114 = vector.extract_strided_slice %90 {offsets = [4, 32], sizes = [1, 32], strides = [1, 1]} : vector<9x128xf32> to vector<1x32xf32>
    %115 = arith.addf %113, %114 : vector<1x32xf32>
    %116 = vector.extract_strided_slice %90 {offsets = [6, 64], sizes = [1, 32], strides = [1, 1]} : vector<9x128xf32> to vector<1x32xf32>
    %117 = arith.addf %115, %116 : vector<1x32xf32>
    %118 = vector.extract_strided_slice %90 {offsets = [7, 96], sizes = [1, 32], strides = [1, 1]} : vector<9x128xf32> to vector<1x32xf32>
    %119 = arith.addf %117, %118 : vector<1x32xf32>
    %cst_34 = arith.constant 0.000000e+00 : f32
    %120 = vector.broadcast %cst_34 : f32 to vector<1x32xf32>
    %121 = arith.maximumf %119, %120 : vector<1x32xf32>
    %122 = vector.extract_strided_slice %90 {offsets = [4, 0], sizes = [1, 32], strides = [1, 1]} : vector<9x128xf32> to vector<1x32xf32>
    %123 = arith.addf %91, %122 : vector<1x32xf32>
    %124 = vector.extract_strided_slice %90 {offsets = [5, 32], sizes = [1, 32], strides = [1, 1]} : vector<9x128xf32> to vector<1x32xf32>
    %125 = arith.addf %123, %124 : vector<1x32xf32>
    %126 = vector.extract_strided_slice %90 {offsets = [7, 64], sizes = [1, 32], strides = [1, 1]} : vector<9x128xf32> to vector<1x32xf32>
    %127 = arith.addf %125, %126 : vector<1x32xf32>
    %128 = vector.extract_strided_slice %90 {offsets = [8, 96], sizes = [1, 32], strides = [1, 1]} : vector<9x128xf32> to vector<1x32xf32>
    %129 = arith.addf %127, %128 : vector<1x32xf32>
    %cst_35 = arith.constant 0.000000e+00 : f32
    %130 = vector.broadcast %cst_35 : f32 to vector<1x32xf32>
    %131 = arith.maximumf %129, %130 : vector<1x32xf32>
    %132 = tpu.concatenate %101, %111, %121, %131 in 1 : vector<1x32xf32>, vector<1x32xf32>, vector<1x32xf32>, vector<1x32xf32> -> vector<1x128xf32>
    %c88 = arith.constant 88 : index
    %c0_36 = arith.constant 0 : index
    %133 = vector.load %arg1[%c88, %c0_36] : memref<280x128xf32, #tpu.memory_space<vmem>>, vector<128x64xf32>
    %c50 = arith.constant 50 : index
    %c0_37 = arith.constant 0 : index
    %134 = vector.load %arg1[%c50, %c0_37] : memref<280x128xf32, #tpu.memory_space<vmem>>, vector<1x64xf32>
    %cst_38 = arith.constant dense<0.000000e+00> : vector<1x64xf32>
    %135 = tpu.matmul %132, %133, %cst_38 {dimension_numbers = #tpu.dot_dimension_numbers<[1], [0], [0], [1], [0, 0, 1, 1], [], []>} : vector<1x128xf32>, vector<128x64xf32>, vector<1x64xf32> -> vector<1x64xf32>
    %136 = arith.addf %135, %134 : vector<1x64xf32>
    %cst_39 = arith.constant 0.000000e+00 : f32
    %137 = vector.broadcast %cst_39 : f32 to vector<1x64xf32>
    %138 = arith.maximumf %136, %137 : vector<1x64xf32>
    %c216 = arith.constant 216 : index
    %c0_40 = arith.constant 0 : index
    %139 = vector.load %arg1[%c216, %c0_40] : memref<280x128xf32, #tpu.memory_space<vmem>>, vector<64x16xf32>
    %c51 = arith.constant 51 : index
    %c0_41 = arith.constant 0 : index
    %140 = vector.load %arg1[%c51, %c0_41] : memref<280x128xf32, #tpu.memory_space<vmem>>, vector<1x16xf32>
    %cst_42 = arith.constant dense<0.000000e+00> : vector<1x16xf32>
    %141 = tpu.matmul %138, %139, %cst_42 {dimension_numbers = #tpu.dot_dimension_numbers<[1], [0], [0], [1], [0, 0, 1, 1], [], []>} : vector<1x64xf32>, vector<64x16xf32>, vector<1x16xf32> -> vector<1x16xf32>
    %142 = arith.addf %141, %140 : vector<1x16xf32>
    %cst_43 = arith.constant 0.000000e+00 : f32
    %143 = vector.broadcast %cst_43 : f32 to vector<1x16xf32>
    %144 = arith.maximumf %142, %143 : vector<1x16xf32>
    %145 = math.tanh %144 : vector<1x16xf32>
    %c0_44 = arith.constant 0 : index
    %c0_45 = arith.constant 0 : index
    %146 = vector.load %arg2[%c0_44, %c0_45] : memref<1x16xf32, #tpu.memory_space<vmem>>, vector<1x16xf32>
    tpu.vector_store %arg2[%c0_44, %c0_45], %145 {strides = array<i32>} : memref<1x16xf32, #tpu.memory_space<vmem>>, vector<1x16xf32>,
    return
  }
}

</mosaic_0001>

<bundles_post_ra>
// kernel: network_forward.1
= control target key start
LH: loop header
LB: loop body
LE: loop exit
PB: predicated region body
PF: predicated region fallthrough
CT: control target
= control target key end

     0   :  { %7 = vsyncpa [#allocation5], 0  ;;  %s712_s0 = inlined_call_operand.hbm [shape: f32[17], index: 0, kind: input, shape index: {}]   ;;  %s713_s1 = inlined_call_operand.hbm [shape: f32[280,128], index: 1, kind: input, shape index: {}]   ;;  %s714_s2 = inlined_call_operand.hbm [shape: f32[1,16], index: 2, kind: output, shape index: {}]  }
   0x1   :  { %8 = vsyncpa [#allocation3], 0 }
   0x2   :  { %9 = vsyncpa [#allocation4], 0  ;;  %s15_s11 = sshll.u32 %s712_s0, 4  ;;  %s23_s14 = sshll.u32 %s713_s1, 4  ;;  %s16_s11 = int_to_ptr.hbm [resolvable:$true] %s15_s11  ;;  %s24_s14 = int_to_ptr.hbm [resolvable:$true] %s23_s14 }
   0x3   :  { %s561_s15 = smov [#allocation2]   ;;  %s562_s16 = smov [#allocation6]  }
   0x4   :  { %18 = dma.hbm_to_smem %s16_s11, 16, %s561_s15, [#allocation5]  }
   0x5   :  { %s25_s17 = sshll.u32 %s562_s16, 4  ;;  %s563_s18 = smov 128   ;;  %s26_s17 = int_to_ptr.vmem [resolvable:$true] %s25_s17 }
   0x6   :  { %s564_s19 = smov 8  }
   0x7   :  { %31 = dma.hbm_to_vmem [thread:$0]  %s24_s14, 4480, %s26_s17, [#allocation3], %s563_s18, %s563_s18, %s564_s19  }
   0x8   :  { %555 = dma.done.wait [#allocation5], 16  }
   0x9   :  { %556 = vsyncadd [#allocation5], 4294967280 }
   0xa   :  { %557 = dma.done.wait [#allocation3], 4480  }
   0xb   :  { %558 = vsyncadd [#allocation3], 4294962816 }
   0xc   :  { %40 = sfence }
   0xd   :  { %s467_s0 = sld [smem:[#allocation2 + $0x3]]  ;;  %v590_v0 = vld [vmem:[#allocation6] sm:$0xff]  ;;  %s565_s22 = smov 32   ;;  %v597_v5 = vld [vmem:[#allocation6 + $0x8] sm:$0x1]  ;;  %v600_v7 = vld [vmem:[#allocation6 + $0x9] sm:$0xff] }
   0xe   :  { %s465_s20 = sld [smem:[#allocation2 + $0x1]]  ;;  %s566_s23 = smov 96   ;;  %v620_v17 = vld [vmem:[#allocation6 + $0x12] sm:$0xff]  ;;  %v624_v20 = vld [vmem:[#allocation6 + $0x11] sm:$0x1]  ;;  %v639_v28 = vld [vmem:[#allocation6 + $0x1b] sm:$0xff] }
   0xf   :  { %s466_s21 = sld [smem:[#allocation2 + $0x2]]  ;;  %s567_s26 = smov 64   ;;  %v643_v31 = vld [vmem:[#allocation6 + $0x1a] sm:$0x1]  ;;  %v657_v40 = vld [vmem:[#allocation6 + $0x23] sm:$0x1] }
  0x10   :  { %s592_s1 = sld [smem:[#allocation2 + $0x5]]  ;;  %v256_v63 = vld [vmem:[#allocation6 + $0x50] sm:$0xff]  ;;  %vm257_vm0 = vcmask 261120   ;;  %vm369_vm1 = vcmask 523264   ;;  %vm371_vm2 = vcmask 785408   ;;  %s568_s10 = smov [#allocation7]  }
  0x11   :  { %s602_s24 = sld [smem:[#allocation2 + $0x6]]  ;;  %276 = vmatpush.msra.mxu0 %v256_v63  ;;  %s452_s11 = sshll.u32 %s568_s10, 4  ;;  %vm445_vm3 = vcmask 122880   ;;  %s453_s11 = int_to_ptr.vmem [resolvable:$true] %s452_s11 }
  0x12   :  { %s471_s25 = sld [smem:[#allocation2 + $0x7]]  ;;  %s454_s14 = sshll.u32 %s714_s2, 4  ;;  %s455_s14 = int_to_ptr.hbm [resolvable:$true] %s454_s14 }
  0x13   :  { %v76_v1 = vstv %s467_s0  ;;  %s611_s27 = sld [smem:[#allocation2 + $0x9]] }
  0x14   :  { %v77_v2 = vmul.f32 %v76_v1, %v590_v0  ;;  %v48_v3 = vstv %s465_s20  ;;  %v78_v14 = vmul.f32 %v76_v1, %v597_v5  ;;  %s474_s28 = sld [smem:[#allocation2 + $0xa]] }
  0x15   :  { %v49_v4 = vmul.f32 %v48_v3, %v590_v0  ;;  %v62_v6 = vstv %s466_s21  ;;  %v50_v10 = vmul.f32 %v48_v3, %v597_v5  ;;  %s475_s29 = sld [smem:[#allocation2 + $0xb]]  ;;  %v254_v3 = vld [vmem:[#allocation6 + $0x40] sm:$0xff] }
  0x16   :  { %81 = vrot.lane.b32.xlu1 %v77_v2, %s565_s22  ;;  %v98_v8 = vstv %s592_s1  ;;  %v63_v11 = vmul.f32 %v62_v6, %v590_v0  ;;  %v64_v12 = vmul.f32 %v62_v6, %v597_v5  ;;  %s631_s30 = sld [smem:[#allocation2 + $0xd]]  ;;  %v255_v2 = vld [vmem:[#allocation6 + $0x48] sm:$0xff] }
  0x17   :  { %53 = vrot.lane.b32.xlu0 %v49_v4, %s566_s23  ;;  %v99_v9 = vmul.f32 %v98_v8, %v600_v7  ;;  %v112_v13 = vstv %s602_s24  ;;  %v100_v22 = vmul.f32 %v98_v8, %v624_v20  ;;  %s478_s3 = sld [smem:[#allocation2 + $0xe]]  ;;  %277 = vmatpush.msra.mxu0 %v255_v2 }
  0x18   :  { %v113_v15 = vmul.f32 %v112_v13, %v600_v7  ;;  %v126_v16 = vstv %s471_s25  ;;  %v114_v23 = vmul.f32 %v112_v13, %v624_v20  ;;  %s479_s4 = sld [smem:[#allocation2 + $0xf]] }
  0x19   :  { %103 = vrot.lane.b32.xlu2 %v99_v9, %s566_s23  ;;  %v148_v18 = vstv %s611_s27  ;;  %v127_v19 = vmul.f32 %v126_v16, %v600_v7  ;;  %v128_v25 = vmul.f32 %v126_v16, %v624_v20  ;;  %s41_s5 = sld [smem:[#allocation2]]  ;;  %278 = vmatpush.msra.mxu0 %v254_v3  ;;  %v253_v9 = vld [vmem:[#allocation6 + $0x38] sm:$0xff] }
  0x1a   :  { %v149_v21 = vmul.f32 %v148_v18, %v620_v17  ;;  %v162_v24 = vstv %s474_s28  ;;  %v150_v33 = vmul.f32 %v148_v18, %v643_v31  ;;  %s666_s6 = sld [smem:[#allocation2 + $0x4]] }
  0x1b   :  { %v163_v26 = vmul.f32 %v162_v24, %v620_v17  ;;  %v176_v27 = vstv %s475_s29  ;;  %v164_v34 = vmul.f32 %v162_v24, %v643_v31  ;;  %s672_s7 = sld [smem:[#allocation2 + $0x8]]  ;;  %279 = vmatpush.msra.mxu0 %v253_v9 }
  0x1c   :  { %v198_v29 = vstv %s631_s30  ;;  %v177_v30 = vmul.f32 %v176_v27, %v620_v17  ;;  %v178_v36 = vmul.f32 %v176_v27, %v643_v31  ;;  %s677_s8 = sld [smem:[#allocation2 + $0xc]] }
  0x1d   :  { %v199_v32 = vmul.f32 %v198_v29, %v639_v28  ;;  %v212_v35 = vstv %s478_s3  ;;  %v200_v42 = vmul.f32 %v198_v29, %v657_v40  ;;  %s680_s9 = sld [smem:[#allocation2 + $0x10]] }
  0x1e   :  { %55 = vrot.lane.b32.xlu1 %v50_v10, %s566_s23  ;;  %v213_v37 = vmul.f32 %v212_v35, %v639_v28  ;;  %v226_v38 = vstv %s479_s4  ;;  %v214_v41 = vmul.f32 %v212_v35, %v657_v40 }
  0x1f   :  { %67 = vrot.lane.b32.xlu0 %v63_v11, %s567_s26  ;;  %v227_v39 = vmul.f32 %v226_v38, %v639_v28  ;;  %v228_v43 = vmul.f32 %v226_v38, %v657_v40  ;;  %v44_v48 = vstv %s41_s5 }
  0x20   :  { %v45_v49 = vmul.f32 %v44_v48, %v590_v0  ;;  %v92_v55 = vstv %s666_s6  ;;  %v46_v60 = vmul.f32 %v44_v48, %v597_v5  ;;  %v492_v48 = vld [vmem:[#allocation6 + $0x30] ss:$0 sm:$0xff] }
  0x21   :  { %69 = vrot.lane.b32.xlu2 %v64_v12, %s567_s26  ;;  %v93_v57 = vmul.f32 %v92_v55, %v600_v7  ;;  %v142_v10 = vstv %s672_s7  ;;  %v94_v11 = vmul.f32 %v92_v55, %v624_v20 }
  0x26   :  { %83 = vrot.lane.b32.xlu1 %v78_v14, %s565_s22  ;;  %v143_v14 = vmul.f32 %v142_v10, %v620_v17  ;;  %v144_v17 = vmul.f32 %v142_v10, %v643_v31 }
  0x27   :  { %117 = vrot.lane.b32.xlu0 %v113_v15, %s567_s26 }
  0x29   :  { %131 = vrot.lane.b32.xlu2 %v127_v19, %s565_s22 }
  0x2e   :  { %153 = vrot.lane.b32.xlu1 %v149_v21, %s566_s23 }
  0x2f   :  { %105 = vrot.lane.b32.xlu0 %v100_v22, %s566_s23 }
  0x31   :  { %119 = vrot.lane.b32.xlu2 %v114_v23, %s567_s26 }
  0x36   :  { %133 = vrot.lane.b32.xlu1 %v128_v25, %s565_s22 }
  0x37   :  { %167 = vrot.lane.b32.xlu0 %v163_v26, %s567_s26  ;;  %v192_v26 = vstv %s677_s8 }
  0x38   :  { %v194_v31 = vmul.f32 %v192_v26, %v657_v40  ;;  %v287_v40 = vld [vmem:[#allocation6 + $0x31] sm:$0x1] }
  0x39   :  { %181 = vrot.lane.b32.xlu2 %v177_v30, %s565_s22 }
  0x3e   :  { %203 = vrot.lane.b32.xlu1 %v199_v32, %s566_s23  ;;  %v193_v32 = vmul.f32 %v192_v26, %v639_v28 }
  0x3f   :  { %155 = vrot.lane.b32.xlu0 %v150_v33, %s566_s23 }
  0x41   :  { %169 = vrot.lane.b32.xlu2 %v164_v34, %s567_s26 }
  0x46   :  { %183 = vrot.lane.b32.xlu1 %v178_v36, %s565_s22  ;;  %v240_v36 = vld [vmem:[#allocation6 + $0x24] sm:$0xff] }
  0x47   :  { %217 = vrot.lane.b32.xlu0 %v213_v37, %s567_s26  ;;  %v242_v37 = vstv %s680_s9 }
  0x49   :  { %231 = vrot.lane.b32.xlu2 %v227_v39, %s565_s22 }
  0x4e   :  { %219 = vrot.lane.b32.xlu1 %v214_v41, %s567_s26 }
  0x4f   :  { %205 = vrot.lane.b32.xlu0 %v200_v42, %s566_s23 }
  0x51   :  { %233 = vrot.lane.b32.xlu2 %v228_v43, %s565_s22 }
  0x73   :  { %v104_v44 = vpop.permute.xlu2 %103 }
  0x7b   :  { %v70_v45 = vpop.permute.xlu2 %69 }
  0x83   :  { %v132_v52 = vpop.permute.xlu2 %131 }
  0x88   :  { %v82_v46 = vpop.permute.xlu1 %81 }
  0x89   :  { %v54_v47 = vpop.permute.xlu0 %53 }
  0x8a   :  { %v59_v50 = vadd.f32 %v54_v47, %v45_v49 }
  0x8b   :  { %v120_v62 = vpop.permute.xlu2 %119 }
  0x90   :  { %v56_v51 = vpop.permute.xlu1 %55 }
  0x91   :  { %v68_v53 = vpop.permute.xlu0 %67  ;;  %v60_v0 = vadd.f32 %v56_v51, %v46_v60 }
  0x92   :  { %v73_v54 = vadd.f32 %v68_v53, %v59_v50  ;;  %v241_v53 = vld [vmem:[#allocation6 + $0x2c] sm:$0x1] }
  0x93   :  { %v74_v7 = vadd.f32 %v70_v45, %v60_v0  ;;  %v182_v12 = vpop.permute.xlu2 %181  ;;  %v243_v45 = vmul.f32 %v242_v37, %v240_v36 }
  0x94   :  { %v87_v56 = vadd.f32 %v82_v46, %v73_v54 }
  0x96   :  { %v95_v61 = vadd.f32 %v93_v57, %v87_v56 }
  0x98   :  { %v84_v58 = vpop.permute.xlu1 %83  ;;  %v109_v1 = vadd.f32 %v104_v44, %v95_v61 }
  0x99   :  { %v118_v59 = vpop.permute.xlu0 %117  ;;  %v88_v5 = vadd.f32 %v84_v58, %v74_v7  ;;  %v244_v58 = vmul.f32 %v242_v37, %v241_v53  ;;  %v415_v53 = vld [vmem:[#allocation6 + $0xf8] sm:$0xff] }
  0x9a   :  { %v123_v8 = vadd.f32 %v118_v59, %v109_v1 }
  0x9b   :  { %v96_v15 = vadd.f32 %v94_v11, %v88_v5  ;;  %v170_v25 = vpop.permute.xlu2 %169  ;;  %v388_v11 = vld [vmem:[#allocation6 + $0xd0] sm:$0xff] }
  0x9c   :  { %v137_v13 = vadd.f32 %v132_v52, %v123_v8  ;;  %390 = vmatpush.msra.mxu1 %v388_v11 }
  0x9e   :  { %v145_v19 = vadd.f32 %v143_v14, %v137_v13 }
  0xa0   :  { %v154_v4 = vpop.permute.xlu1 %153 }
  0xa1   :  { %v106_v6 = vpop.permute.xlu0 %105  ;;  %v159_v22 = vadd.f32 %v154_v4, %v145_v19  ;;  %v385_v19 = vld [vmem:[#allocation6 + $0xb8] sm:$0xff] }
  0xa2   :  { %v110_v21 = vadd.f32 %v106_v6, %v96_v15 }
  0xa3   :  { %v232_v39 = vpop.permute.xlu2 %231 }
  0xa4   :  { %v124_v23 = vadd.f32 %v120_v62, %v110_v21 }
  0xa8   :  { %v134_v16 = vpop.permute.xlu1 %133 }
  0xa9   :  { %v168_v18 = vpop.permute.xlu0 %167  ;;  %v138_v20 = vadd.f32 %v134_v16, %v124_v23  ;;  %v386_v16 = vld [vmem:[#allocation6 + $0xc0] sm:$0xff] }
  0xaa   :  { %v173_v24 = vadd.f32 %v168_v18, %v159_v22 }
  0xab   :  { %v146_v33 = vadd.f32 %v144_v17, %v138_v20  ;;  %v234_v56 = vpop.permute.xlu2 %233 }
  0xac   :  { %v187_v30 = vadd.f32 %v182_v12, %v173_v24  ;;  %v387_v12 = vld [vmem:[#allocation6 + $0xc8] sm:$0xff] }
  0xad   :  { %391 = vmatpush.msra.mxu1 %v387_v12 }
  0xae   :  { %v195_v34 = vadd.f32 %v193_v32, %v187_v30 }
  0xaf   :  { %392 = vmatpush.msra.mxu1 %v386_v16 }
  0xb0   :  { %v204_v27 = vpop.permute.xlu1 %203 }
  0xb1   :  { %v156_v29 = vpop.permute.xlu0 %155  ;;  %v209_v38 = vadd.f32 %v204_v27, %v195_v34  ;;  %393 = vmatpush.msra.mxu1 %v385_v19 }
  0xb2   :  { %v160_v35 = vadd.f32 %v156_v29, %v146_v33 }
  0xb4   :  { %v174_v43 = vadd.f32 %v170_v25, %v160_v35 }
  0xb8   :  { %v184_v41 = vpop.permute.xlu1 %183 }
  0xb9   :  { %v218_v42 = vpop.permute.xlu0 %217  ;;  %v188_v46 = vadd.f32 %v184_v41, %v174_v43  ;;  %v383_v41 = vld [vmem:[#allocation6 + $0xa8] sm:$0xff]  ;;  %v381_v43 = vld [vmem:[#allocation6 + $0x98] sm:$0xff] }
  0xba   :  { %v223_v44 = vadd.f32 %v218_v42, %v209_v38  ;;  %v382_v42 = vld [vmem:[#allocation6 + $0xa0] sm:$0xff] }
  0xbb   :  { %v196_v50 = vadd.f32 %v194_v31, %v188_v46  ;;  %v378_v46 = vld [vmem:[#allocation6 + $0x80] sm:$0xff]  ;;  %v376_v31 = vld [vmem:[#allocation6 + $0x70] sm:$0xff] }
  0xbc   :  { %v237_v47 = vadd.f32 %v232_v39, %v223_v44  ;;  %v384_v39 = vld [vmem:[#allocation6 + $0xb0] sm:$0xff] }
  0xbd   :  { %394 = vmatpush.msra.mxu1 %v384_v39  ;;  %v380_v44 = vld [vmem:[#allocation6 + $0x90] sm:$0xff] }
  0xbe   :  { %v245_v49 = vadd.f32 %v243_v45, %v237_v47  ;;  %v379_v45 = vld [vmem:[#allocation6 + $0x88] sm:$0xff]  ;;  %v377_v47 = vld [vmem:[#allocation6 + $0x78] sm:$0xff] }
  0xbf   :  { %395 = vmatpush.msra.mxu1 %v383_v41 }
  0xc0   :  { %v249_v28 = vadd.f32 %v492_v48, %v245_v49  ;;  %v220_v52 = vpop.permute.xlu1 %219  ;;  %v374_v49 = vld [vmem:[#allocation6 + $0x60] sm:$0xff] }
  0xc1   :  { %v206_v51 = vpop.permute.xlu0 %205  ;;  %396 = vmatpush.msra.mxu1 %v382_v42 }
  0xc2   :  { %v210_v54 = vadd.f32 %v206_v51, %v196_v50  ;;  %v251_v55 = vmax.f32 %v249_v28, 0.0  ;;  %v373_v50 = vld [vmem:[#allocation6 + $0x58] sm:$0xff]  ;;  %v418_v28 = vld [vmem:[#allocation6 + $0x110] sm:$0xff]  ;;  %v417_v51 = vld [vmem:[#allocation6 + $0x108] sm:$0xff] }
  0xc3   :  { %397 = vmatpush.msra.mxu1 %v381_v43  ;;  %431 = vmatpush.msra.mxu2 %v418_v28 }
  0xc4   :  { %v224_v57 = vadd.f32 %v220_v52, %v210_v54  ;;  %481 = vmatmul.msk.f32.vlgmr.msra.gmra.mxu0 %vm257_vm0, %v251_v55  ;;  %v416_v52 = vld [vmem:[#allocation6 + $0x100] sm:$0xff]  ;;  %v414_v54 = vld [vmem:[#allocation6 + $0xf0] sm:$0xff] }
  0xc5   :  { %398 = vmatpush.msra.mxu1 %v380_v44  ;;  %432 = vmatpush.msra.mxu2 %v417_v51 }
  0xc6   :  { %v238_v59 = vadd.f32 %v234_v56, %v224_v57 }
  0xc7   :  { %399 = vmatpush.msra.mxu1 %v379_v45  ;;  %433 = vmatpush.msra.mxu2 %v416_v52 }
  0xc8   :  { %v246_v60 = vadd.f32 %v244_v58, %v238_v59 }
  0xc9   :  { %400 = vmatpush.msra.mxu1 %v378_v46  ;;  %434 = vmatpush.msra.mxu2 %v415_v53 }
  0xca   :  { %v250_v61 = vadd.f32 %v492_v48, %v246_v60  ;;  %v375_v48 = vld [vmem:[#allocation6 + $0x68] sm:$0xff] }
  0xcb   :  { %401 = vmatpush.msra.mxu1 %v377_v47  ;;  %435 = vmatpush.msra.mxu2 %v414_v54 }
  0xcc   :  { %v252_v62 = vmax.f32 %v250_v61, 0.0 }
  0xcd   :  { %402 = vmatpush.msra.mxu1 %v376_v31 }
  0xce   :  { %482 = vmatmul.msk.f32.gmra.mxu0 %vm257_vm0, %v252_v62 }
  0xcf   :  { %403 = vmatpush.msra.mxu1 %v375_v48 }
  0xd1   :  { %404 = vmatpush.msra.mxu1 %v374_v49 }
  0xd3   :  { %405 = vmatpush.msra.mxu1 %v373_v50 }
 0x141   :  { %v281_v63 = vpop.f32.mrf.mxu0 }
 0x142   :  { %v308_v0 = vrot.slane %v281_v63, 2  ;;  %v300_v1 = vrot.slane %v281_v63, 4  ;;  %v688_v2 = vadd.f32 %v287_v40, %v281_v63  ;;  %v317_v3 = vrot.slane %v281_v63, 5 }
 0x143   :  { %v329_v4 = vrot.slane %v281_v63, 6  ;;  %v334_v6 = vrot.slane %v281_v63, 7  ;;  %v290_v8 = vrot.slane %v281_v63, 1  ;;  %v295_v9 = vrot.slane %v281_v63, 3 }
 0x144   :  { %309 = vrot.lane.b32.xlu0 %v308_v0, %s566_s23  ;;  %313 = vrot.lane.b32.xlu2 %v300_v1, %s567_s26  ;;  %v341_v20 = vadd.f32 %v300_v1, %v287_v40 }
 0x145   :  { %325 = vrot.lane.b32.xlu1 %v300_v1, %s566_s23  ;;  %v307_v5 = vadd.f32 %v290_v8, %v287_v40  ;;  %v324_v26 = vadd.f32 %v295_v9, %v287_v40 }
 0x14b   :  { %v284_v7 = vpop.f32.mrf.mxu0 }
 0x14c   :  { %342 = vrot.lane.b32.xlu0 %v317_v3, %s566_s23  ;;  %318 = vrot.lane.b32.xlu2 %v317_v3, %s565_s22 }
 0x14d   :  { %330 = vrot.lane.b32.xlu1 %v329_v4, %s567_s26  ;;  %v413_v4 = vld [vmem:[#allocation6 + $0xe8] sm:$0xff] }
 0x14e   :  { %436 = vmatpush.msra.mxu2 %v413_v4 }
 0x154   :  { %346 = vrot.lane.b32.xlu0 %v334_v6, %s567_s26  ;;  %351 = vrot.lane.b32.xlu2 %v284_v7, %s565_s22  ;;  %v389_v7 = vld [vmem:[#allocation6 + $0x32] sm:$0x1] }
 0x155   :  { %335 = vrot.lane.b32.xlu1 %v334_v6, %s565_s22  ;;  %v412_v6 = vld [vmem:[#allocation6 + $0xe0] sm:$0xff] }
 0x156   :  { %437 = vmatpush.msra.mxu2 %v412_v6 }
 0x15c   :  { %291 = vrot.lane.b32.xlu0 %v290_v8, %s566_s23  ;;  %301 = vrot.lane.b32.xlu2 %v300_v1, %s565_s22 }
 0x15d   :  { %296 = vrot.lane.b32.xlu1 %v295_v9, %s567_s26 }
 0x19e   :  { %v314_v10 = vpop.permute.xlu2 %313 }
 0x1a6   :  { %v319_v21 = vpop.permute.xlu2 %318 }
 0x1ae   :  { %v352_v34 = vpop.permute.xlu2 %351 }
 0x1b6   :  { %v310_v13 = vpop.permute.xlu0 %309  ;;  %v302_v59 = vpop.permute.xlu2 %301 }
 0x1b7   :  { %v312_v14 = vadd.f32 %v310_v13, %v307_v5  ;;  %v326_v15 = vpop.permute.xlu1 %325  ;;  %v419_v5 = vld [vmem:[#allocation6 + $0x33] sm:$0x1] }
 0x1b8   :  { %v328_v27 = vadd.f32 %v326_v15, %v324_v26 }
 0x1b9   :  { %v316_v18 = vadd.f32 %v314_v10, %v312_v14 }
 0x1bb   :  { %v321_v22 = vadd.f32 %v319_v21, %v316_v18 }
 0x1bd   :  { %v322_v23 = vmax.f32 %v321_v22, 0.0 }
 0x1be   :  { %v343_v24 = vpop.permute.xlu0 %342 }
 0x1bf   :  { %v331_v25 = vpop.permute.xlu1 %330  ;;  %357 = vrot.lane.b32.xlu0 %v322_v23, %s565_s22  ;;  %v345_v17 = vadd.f32 %v343_v24, %v341_v20 }
 0x1c0   :  { %v333_v29 = vadd.f32 %v331_v25, %v328_v27 }
 0x1c6   :  { %v347_v30 = vpop.permute.xlu0 %346 }
 0x1c7   :  { %v349_v32 = vadd.f32 %v347_v30, %v345_v17  ;;  %v336_v33 = vpop.permute.xlu1 %335 }
 0x1c8   :  { %v338_v35 = vadd.f32 %v336_v33, %v333_v29 }
 0x1c9   :  { %v354_v36 = vadd.f32 %v352_v34, %v349_v32 }
 0x1ca   :  { %v339_v37 = vmax.f32 %v338_v35, 0.0 }
 0x1cb   :  { %v355_v38 = vmax.f32 %v354_v36, 0.0 }
 0x1cc   :  { %361 = vrot.lane.b32.xlu1 %v339_v37, %s567_s26 }
 0x1cd   :  { %365 = vrot.lane.b32.xlu2 %v355_v38, %s566_s23 }
 0x1ce   :  { %v292_v55 = vpop.permute.xlu0 %291 }
 0x1cf   :  { %v294_v56 = vadd.f32 %v292_v55, %v688_v2  ;;  %v297_v57 = vpop.permute.xlu1 %296  ;;  %v411_v2 = vld [vmem:[#allocation6 + $0xd8] sm:$0xff] }
 0x1d0   :  { %438 = vmatpush.msra.mxu2 %v411_v2 }
 0x1d1   :  { %v299_v58 = vadd.f32 %v297_v57, %v294_v56 }
 0x1d3   :  { %v304_v60 = vadd.f32 %v302_v59, %v299_v58 }
 0x1d5   :  { %v305_v62 = vmax.f32 %v304_v60, 0.0 }
 0x227   :  { %v366_v0 = vpop.permute.xlu2 %365 }
 0x231   :  { %v358_v61 = vpop.permute.xlu0 %357 }
 0x232   :  { %v368_v40 = vsel %vm257_vm0, %v305_v62, %v358_v61 }
 0x23e   :  { %v362_v63 = vpop.permute.xlu1 %361 }
 0x23f   :  { %v370_v1 = vsel %vm369_vm1, %v368_v40, %v362_v63 }
 0x240   :  { %v372_v3 = vsel %vm371_vm2, %v370_v1, %v366_v0 }
 0x241   :  { %406 = vmatmul.f32.vlgmr.msra.gmra.mxu1 %v372_v3 }
 0x2be   :  { %v407_v8 = vpop.f32.mrf.mxu1 }
 0x2bf   :  { %v408_v9 = vadd.f32 %v407_v8, %v389_v7 }
 0x2c1   :  { %v410_v10 = vmax.f32 %v408_v9, 0.0 }
 0x2c3   :  { %483 = vmatmul.msk.f32.vlgmr.msra.gmra.mxu2 %vm369_vm1, %v410_v10 }
 0x346   :  { %v440_v11 = vpop.f32.mrf.mxu2 }
 0x347   :  { %v441_v12 = vadd.f32 %v440_v11, %v419_v5 }
 0x349   :  { %v443_v13 = vmax.f32 %v441_v12, 0.0 }
 0x34b   :  { %493 = vtanh.f32 %v443_v13 }
 0x351   :  { %v494_v14 = vpop.eup %493 }
 0x352   :  { %446 = vst.msk [vmem:[#allocation7] sm:$0x1] %vm445_vm3, %v494_v14 }
 0x353   :  { %457 = dma.vmem_to_hbm [thread:$0]  %s453_s11, 16, %s455_s14, [#allocation4]  }
 0x354   :  { %559 = dma.done.wait [#allocation4], 16  }
 0x355   :  { %560 = vsyncadd [#allocation4], 4294967280 }
 0x356   :  { %462 = vsyncpa [#allocation3], 1 }
 0x357   :  { %463 = vsyncpa [#allocation4], 1 }
 0x358   :  { %464 = vsyncpa [#allocation5], 1 }

</bundles_post_ra>
